<compile_context>
chip_gen: v7x
topology: tpu7x:2x2x1
jax: 0.10.0
libtpu: 0.0.40
codegen_flags: <defaults>
</compile_context>

<pallas_src>
import functools

import jax
import jax.numpy as jnp
from jax.experimental import pallas as pl
from jax.experimental.pallas import tpu as pltpu

N = 32                         # nodes per graph
DIM = 32                       # hidden dim
NUM_HEADS = 4
HEAD_DIM = DIM // NUM_HEADS    # 8
HN = NUM_HEADS * N             # 128 packed score columns (c = head*N + src)
HIDDEN_MULT = 2
HIDDEN = DIM * HIDDEN_MULT     # 64
NEG_SLOPE = 0.2                # LeakyReLU negative slope
_BIG = 1e30
_INV_SQRT2 = 0.7071067811865476


def _erf(x):
    # Abramowitz & Stegun 7.1.26 rational approximation (|err| < 1.5e-7),
    # built only from ops Mosaic is guaranteed to lower (exp, abs, where).
    a1, a2, a3, a4, a5 = 0.254829592, -0.284496736, 1.421413741, -1.453152027, 1.061405429
    p = 0.3275911
    ax = jnp.abs(x)
    t = 1.0 / (1.0 + p * ax)
    poly = ((((a5 * t + a4) * t + a3) * t + a2) * t + a1) * t
    y = 1.0 - poly * jnp.exp(-ax * ax)
    return jnp.where(x >= 0.0, y, -y)


def _gelu_exact(x):
    # torch nn.GELU() default ('none'): 0.5 * x * (1 + erf(x / sqrt(2)))
    return 0.5 * x * (1.0 + _erf(x * _INV_SQRT2))


def gat_kernel(x_ref, adj_ref, w_in_ref, b_in_ref, w_attn_ref, bu_row_ref,
               rep_ref, rep_rows_ref, sel_f32_ref, sel_agg_ref,
               w1_ref, b1_ref, w2_ref, b2_ref, out_ref, *, use_bf16):
    f32 = jnp.float32
    x = x_ref[...]                        # [N, DIM]
    adj = adj_ref[...]                    # [N_dst, N_src]

    # input_linear (weights pre-transposed to [in, out])
    h = jnp.dot(x, w_in_ref[...], preferred_element_type=f32) + b_in_ref[...]

    # Both attention projections in ONE lane-dense matmul:
    #   columns [0, HN)    sv_expand[dst, k*N+j] = sv[dst, k]
    #   columns [HN, 2HN)  su_all[row,  k*N+j]   = (h @ wu^T)[row, k]
    sc = jnp.dot(h, w_attn_ref[...], preferred_element_type=f32)      # [N, 2*HN]
    sv_e = sc[:, :HN]                                                  # lane-tile-aligned slice
    su_all = sc[:, HN:]

    # src-side scores dropped into their packed columns via the MXU:
    #   su_mat[dst, k*N+src] = su[src, k]  (same for every dst row).
    rep = rep_ref[...]                                                 # [N, HN], rep[s, k*N+j] = (j==s)
    ones = jnp.ones((N, N), f32)
    su_mat = jnp.dot(ones, rep * su_all, preferred_element_type=f32)   # [N, HN]

    # ops.u_add_v  +  LeakyReLU (slope in (0,1) => leaky(x) = max(x, slope*x))
    s = sv_e + su_mat + bu_row_ref[...]
    s = jnp.maximum(s, NEG_SLOPE * s)

    # Additive edge mask, tiled per head on the MXU (no boolean mask / selects).
    bias = jnp.dot((adj - 1.0) * _BIG, rep, preferred_element_type=f32)  # 0 or -1e30
    s = s + bias

    # edge_softmax per (dst, head): shift by the per-dst row max over all heads
    # (constant within each head's lane group, so the normalized softmax is
    # unchanged; scores are O(1) at this init so no per-head underflow risk).
    # Masked entries underflow exp() to exactly 0 -> no select needed.
    m = jnp.max(s, axis=1, keepdims=True)                              # [N, 1]
    e = jnp.exp(s - m)                                                 # [N, HN] f32

    # ops.u_mul_e_sum for all heads as ONE lane-dense K=128 matmul.
    agg_dtype = jnp.bfloat16 if use_bf16 else f32
    h_rep = jnp.dot(rep_rows_ref[...], h, preferred_element_type=f32)  # [HN, DIM] (MXU replication)
    h_stack = h_rep.astype(agg_dtype) * sel_agg_ref[...]               # head selection
    agg_un = jnp.dot(e.astype(agg_dtype), h_stack,
                     preferred_element_type=f32)                       # [N, DIM]
    # Softmax denominator stays f32 (review correctness note).
    denom = jnp.dot(e, sel_f32_ref[...], preferred_element_type=f32)   # [N, DIM]
    agg = agg_un * pl.reciprocal(denom, approx=True)

    # FeedForwardModule: linear -> (dropout=id) -> GELU -> linear -> (dropout=id)
    z = jnp.dot(agg, w1_ref[...], preferred_element_type=f32) + b1_ref[...]
    z = _gelu_exact(z)
    z = jnp.dot(z, w2_ref[...], preferred_element_type=f32) + b2_ref[...]
    out_ref[...] = z


@functools.partial(jax.jit, static_argnames=("use_bf16",))
def gat_forward(x, adj, prepped, use_bf16):
    B = x.shape[0]
    kernel = functools.partial(gat_kernel, use_bf16=use_bf16)

    def full_spec(arr):
        nd = arr.ndim
        return pl.BlockSpec(arr.shape, lambda b, _n=nd: (0,) * _n)

    def batched_spec(shape):
        return pl.BlockSpec((None,) + shape, lambda b: (b, 0, 0))

    weights = (prepped['w_in_t'], prepped['b_in'],
               prepped['w_attn'], prepped['bu_row'],
               prepped['rep'], prepped['rep_rows'],
               prepped['sel_f32'], prepped['sel_agg'],
               prepped['w1_t'], prepped['b1'],
               prepped['w2_t'], prepped['b2'])
    inputs = (x, adj) + weights

    in_specs = ([batched_spec((N, DIM)), batched_spec((N, N))]
                + [full_spec(w) for w in weights])
    out_spec = batched_spec((N, DIM))

    flops = 2 * B * (N * DIM * DIM            # input linear
                     + N * DIM * 2 * HN       # fused attention projections
                     + 2 * N * N * HN         # su broadcast + adj tiling
                     + HN * N * DIM           # h replication
                     + 2 * N * HN * DIM       # aggregation + denominator
                     + N * DIM * HIDDEN + N * HIDDEN * DIM)   # FFN
    transcendentals = B * (N * HN + N * HIDDEN + N * DIM)
    bytes_accessed = int(sum(v.size * v.dtype.itemsize for v in inputs)
                         + B * N * DIM * 4)

    return pl.pallas_call(
        kernel,
        out_shape=jax.ShapeDtypeStruct((B, N, DIM), jnp.float32),
        grid=(B,),
        in_specs=in_specs,
        out_specs=out_spec,
        compiler_params=pltpu.CompilerParams(
            dimension_semantics=("parallel",)),       # graphs split across TCs on v7x
        cost_estimate=pl.CostEstimate(flops=flops,
                                      transcendentals=transcendentals,
                                      bytes_accessed=bytes_accessed),
    )(*inputs)


def init_params(key):
    # PyTorch-style Linear init (uniform +-1/sqrt(fan_in)); torch [out, in] layout.
    def linear(k, fan_in, fan_out):
        k1, k2 = jax.random.split(k)
        bound = 1.0 / float(fan_in) ** 0.5
        w = jax.random.uniform(k1, (fan_out, fan_in), jnp.float32, -bound, bound)
        b = jax.random.uniform(k2, (1, fan_out), jnp.float32, -bound, bound)
        return w, b

    ks = jax.random.split(key, 5)
    w_in, b_in = linear(ks[0], DIM, DIM)
    wu, bu = linear(ks[1], DIM, NUM_HEADS)
    wv, _ = linear(ks[2], DIM, NUM_HEADS)     # attn_linear_v has no bias
    w1, b1 = linear(ks[3], DIM, HIDDEN)
    w2, b2 = linear(ks[4], HIDDEN, DIM)
    return dict(w_in=w_in, b_in=b_in, wu=wu, bu=bu, wv=wv,
                w1=w1, b1=b1, w2=w2, b2=b2)


def prepare_params(p, use_bf16):
    """One-time kernel-ready packing: all head expansion / replication /
    selection matrices are precomputed so the kernel hot path does no
    transposes, slices or concats."""
    eye = jnp.eye(N, dtype=jnp.float32)
    rep = jnp.tile(eye, (1, NUM_HEADS))                # [N, HN]  rep[s, k*N+j] = (j==s)
    rep_rows = jnp.tile(eye, (NUM_HEADS, 1))           # [HN, N]  rep_rows[k*N+s, s'] = (s'==s)
    rows = jnp.arange(HN, dtype=jnp.int32) // N        # head of packed row
    cols = jnp.arange(DIM, dtype=jnp.int32) % NUM_HEADS  # head owning feature column
    sel = (rows[:, None] == cols[None, :]).astype(jnp.float32)   # [HN, DIM]

    wv_expand = jnp.repeat(p['wv'].T, N, axis=1)       # [DIM, HN], col k*N+j = wv[k,:]
    wu_expand = jnp.repeat(p['wu'].T, N, axis=1)       # [DIM, HN]
    w_attn = jnp.concatenate([wv_expand, wu_expand], axis=1)     # [DIM, 2*HN]
    bu_row = jnp.repeat(p['bu'][0], N).reshape(1, HN)  # [1, HN], col k*N+j = bu[k]

    agg_dtype = jnp.bfloat16 if use_bf16 else jnp.float32
    return dict(
        w_in_t=p['w_in'].T, b_in=p['b_in'],
        w_attn=w_attn, bu_row=bu_row,
        rep=rep, rep_rows=rep_rows,
        sel_f32=sel, sel_agg=sel.astype(agg_dtype),
        w1_t=p['w1'].T, b1=p['b1'],
        w2_t=p['w2'].T, b2=p['b2'],
    )


def _detect_use_bf16():
    # bf16 aggregation operands on v6e/v7x (native bf16 VPU/MXU); f32 on v5e.
    try:
        kind = jax.devices()[0].device_kind.lower()
    except Exception:
        return True
    return not any(tag in kind for tag in ("v5 lite", "v5litepod", "v5e"))


def gat_reference(x, adj, params):
    # Pure-JAX reference of the same semantics (dense-masked GAT), f32 HIGHEST.
    hp = jax.lax.Precision.HIGHEST
    h = jnp.dot(x, params['w_in'].T, precision=hp) + params['b_in'][0]
    su = jnp.dot(h, params['wu'].T, precision=hp) + params['bu'][0]
    sv = jnp.dot(h, params['wv'].T, precision=hp)
    s = sv[:, None, :] + su[None, :, :]                 # [dst, src, H]
    s = jnp.where(s >= 0.0, s, NEG_SLOPE * s)
    mask = (adj > 0.0)[:, :, None]
    s = jnp.where(mask, s, -jnp.inf)
    m = jnp.max(s, axis=1, keepdims=True)
    e = jnp.where(mask, jnp.exp(s - m), 0.0)
    prob = e / jnp.sum(e, axis=1, keepdims=True)        # edge softmax per dst
    h3 = h.reshape(N, HEAD_DIM, NUM_HEADS)
    agg = jnp.einsum('dsk,sjk->djk', prob, h3, precision=hp).reshape(N, DIM)
    z = jnp.dot(agg, params['w1'].T, precision=hp) + params['b1'][0]
    z = jax.nn.gelu(z, approximate=False)
    z = jnp.dot(z, params['w2'].T, precision=hp) + params['b2'][0]
    return z


if __name__ == "__main__":
    key = jax.random.PRNGKey(0)
    k_adj, k_x, k_p = jax.random.split(key, 3)

    B = 2   # two independent graphs -> exercises the parallel batch grid axis
    # Synthetic graphs: random sparse edges + self loops (edge_softmax needs
    # every dst to have at least one in-edge).
    adj = (jax.random.uniform(k_adj, (B, N, N)) < 0.3).astype(jnp.float32)
    adj = jnp.maximum(adj, jnp.eye(N, dtype=jnp.float32)[None])

    x = jax.random.normal(k_x, (B, N, DIM), jnp.float32)
    params = init_params(k_p)
    use_bf16 = _detect_use_bf16()
    prepped = prepare_params(params, use_bf16)   # hoisted one-time packing

    out = jax.block_until_ready(gat_forward(x, adj, prepped, use_bf16))
    ref = jnp.stack([gat_reference(x[b], adj[b], params) for b in range(B)])

    assert out.shape == (B, N, DIM) and out.dtype == jnp.float32
    assert bool(jnp.all(jnp.isfinite(out)))
    max_err = float(jnp.max(jnp.abs(out - ref)))
    assert max_err < 1e-2, f"mismatch vs reference: {max_err}"
    print("KERNEL_OK")
</pallas_src>

<mosaic_0001>
module attributes {stable_mosaic.version = 11 : i64} {
  func.func @gat_kernel(%arg0: i32, %arg1: memref<1x32x32xf32, #tpu.memory_space<vmem>>, %arg2: memref<1x32x32xf32, #tpu.memory_space<vmem>>, %arg3: memref<32x32xf32, #tpu.memory_space<vmem>>, %arg4: memref<1x32xf32, #tpu.memory_space<vmem>>, %arg5: memref<32x256xf32, #tpu.memory_space<vmem>>, %arg6: memref<1x128xf32, #tpu.memory_space<vmem>>, %arg7: memref<32x128xf32, #tpu.memory_space<vmem>>, %arg8: memref<128x32xf32, #tpu.memory_space<vmem>>, %arg9: memref<128x32xf32, #tpu.memory_space<vmem>>, %arg10: memref<128x32xbf16, #tpu.memory_space<vmem>>, %arg11: memref<32x64xf32, #tpu.memory_space<vmem>>, %arg12: memref<1x64xf32, #tpu.memory_space<vmem>>, %arg13: memref<64x32xf32, #tpu.memory_space<vmem>>, %arg14: memref<1x32xf32, #tpu.memory_space<vmem>>, %arg15: memref<1x32x32xf32, #tpu.memory_space<vmem>>) attributes {dimension_semantics = [#tpu.dimension_semantics<parallel>], iteration_bounds = array<i64: 2>, scalar_prefetch = 0 : i64, scratch_operands = 0 : i64, tpu.core_type = #tpu.core_type<tc>, window_params = [{transform_indices = @transform_0, window_bounds = array<i64: 1, 32, 32>}, {transform_indices = @transform_1, window_bounds = array<i64: 1, 32, 32>}, {pipeline_mode = #tpu.pipeline_mode<synchronous>, transform_indices = @transform_2, window_bounds = array<i64: 32, 32>}, {pipeline_mode = #tpu.pipeline_mode<synchronous>, transform_indices = @transform_3, window_bounds = array<i64: 1, 32>}, {pipeline_mode = #tpu.pipeline_mode<synchronous>, transform_indices = @transform_4, window_bounds = array<i64: 32, 256>}, {pipeline_mode = #tpu.pipeline_mode<synchronous>, transform_indices = @transform_5, window_bounds = array<i64: 1, 128>}, {pipeline_mode = #tpu.pipeline_mode<synchronous>, transform_indices = @transform_6, window_bounds = array<i64: 32, 128>}, {pipeline_mode = #tpu.pipeline_mode<synchronous>, transform_indices = @transform_7, window_bounds = array<i64: 128, 32>}, {pipeline_mode = #tpu.pipeline_mode<synchronous>, transform_indices = @transform_8, window_bounds = array<i64: 128, 32>}, {pipeline_mode = #tpu.pipeline_mode<synchronous>, transform_indices = @transform_9, window_bounds = array<i64: 128, 32>}, {pipeline_mode = #tpu.pipeline_mode<synchronous>, transform_indices = @transform_10, window_bounds = array<i64: 32, 64>}, {pipeline_mode = #tpu.pipeline_mode<synchronous>, transform_indices = @transform_11, window_bounds = array<i64: 1, 64>}, {pipeline_mode = #tpu.pipeline_mode<synchronous>, transform_indices = @transform_12, window_bounds = array<i64: 64, 32>}, {pipeline_mode = #tpu.pipeline_mode<synchronous>, transform_indices = @transform_13, window_bounds = array<i64: 1, 32>}, {transform_indices = @transform_14, window_bounds = array<i64: 1, 32, 32>}]} {
    %c0 = arith.constant 0 : index
    %c0_0 = arith.constant 0 : index
    %c0_1 = arith.constant 0 : index
    %0 = vector.load %arg1[%c0, %c0_0, %c0_1] : memref<1x32x32xf32, #tpu.memory_space<vmem>>, vector<1x32x32xf32>
    %1 = vector.shape_cast %0 : vector<1x32x32xf32> to vector<32x32xf32>
    %c0_2 = arith.constant 0 : index
    %c0_3 = arith.constant 0 : index
    %c0_4 = arith.constant 0 : index
    %2 = vector.load %arg2[%c0_2, %c0_3, %c0_4] : memref<1x32x32xf32, #tpu.memory_space<vmem>>, vector<1x32x32xf32>
    %3 = vector.shape_cast %2 : vector<1x32x32xf32> to vector<32x32xf32>
    %c0_5 = arith.constant 0 : index
    %c0_6 = arith.constant 0 : index
    %4 = vector.load %arg3[%c0_5, %c0_6] : memref<32x32xf32, #tpu.memory_space<vmem>>, vector<32x32xf32>
    %cst = arith.constant dense<0.000000e+00> : vector<32x32xf32>
    %5 = tpu.matmul %1, %4, %cst {dimension_numbers = #tpu.dot_dimension_numbers<[1], [0], [0], [1], [0, 0, 1, 1], [], []>} : vector<32x32xf32>, vector<32x32xf32>, vector<32x32xf32> -> vector<32x32xf32>
    %c0_7 = arith.constant 0 : index
    %c0_8 = arith.constant 0 : index
    %6 = vector.load %arg4[%c0_7, %c0_8] : memref<1x32xf32, #tpu.memory_space<vmem>>, vector<1x32xf32>
    %7 = vector.broadcast %6 : vector<1x32xf32> to vector<32x32xf32>
    %8 = arith.addf %5, %7 : vector<32x32xf32>
    %c0_9 = arith.constant 0 : index
    %c0_10 = arith.constant 0 : index
    %9 = vector.load %arg5[%c0_9, %c0_10] : memref<32x256xf32, #tpu.memory_space<vmem>>, vector<32x256xf32>
    %cst_11 = arith.constant dense<0.000000e+00> : vector<32x256xf32>
    %10 = tpu.matmul %8, %9, %cst_11 {dimension_numbers = #tpu.dot_dimension_numbers<[1], [0], [0], [1], [0, 0, 1, 1], [], []>} : vector<32x32xf32>, vector<32x256xf32>, vector<32x256xf32> -> vector<32x256xf32>
    %11 = vector.extract_strided_slice %10 {offsets = [0, 0], sizes = [32, 128], strides = [1, 1]} : vector<32x256xf32> to vector<32x128xf32>
    %12 = vector.extract_strided_slice %10 {offsets = [0, 128], sizes = [32, 128], strides = [1, 1]} : vector<32x256xf32> to vector<32x128xf32>
    %c0_12 = arith.constant 0 : index
    %c0_13 = arith.constant 0 : index
    %13 = vector.load %arg7[%c0_12, %c0_13] : memref<32x128xf32, #tpu.memory_space<vmem>>, vector<32x128xf32>
    %cst_14 = arith.constant 1.000000e+00 : f32
    %14 = vector.broadcast %cst_14 : f32 to vector<32x32xf32>
    %15 = arith.mulf %13, %12 : vector<32x128xf32>
    %cst_15 = arith.constant dense<0.000000e+00> : vector<32x128xf32>
    %16 = tpu.matmul %14, %15, %cst_15 {dimension_numbers = #tpu.dot_dimension_numbers<[1], [0], [0], [1], [0, 0, 1, 1], [], []>} : vector<32x32xf32>, vector<32x128xf32>, vector<32x128xf32> -> vector<32x128xf32>
    %17 = arith.addf %11, %16 : vector<32x128xf32>
    %c0_16 = arith.constant 0 : index
    %c0_17 = arith.constant 0 : index
    %18 = vector.load %arg6[%c0_16, %c0_17] : memref<1x128xf32, #tpu.memory_space<vmem>>, vector<1x128xf32>
    %19 = vector.broadcast %18 : vector<1x128xf32> to vector<32x128xf32>
    %20 = arith.addf %17, %19 : vector<32x128xf32>
    %cst_18 = arith.constant 2.000000e-01 : f32
    %21 = vector.broadcast %cst_18 : f32 to vector<32x128xf32>
    %22 = arith.mulf %21, %20 : vector<32x128xf32>
    %23 = arith.maximumf %20, %22 : vector<32x128xf32>
    %cst_19 = arith.constant 1.000000e+00 : f32
    %24 = vector.broadcast %cst_19 : f32 to vector<32x32xf32>
    %25 = arith.subf %3, %24 : vector<32x32xf32>
    %cst_20 = arith.constant 1.000000e+30 : f32
    %26 = vector.broadcast %cst_20 : f32 to vector<32x32xf32>
    %27 = arith.mulf %25, %26 : vector<32x32xf32>
    %cst_21 = arith.constant dense<0.000000e+00> : vector<32x128xf32>
    %28 = tpu.matmul %27, %13, %cst_21 {dimension_numbers = #tpu.dot_dimension_numbers<[1], [0], [0], [1], [0, 0, 1, 1], [], []>} : vector<32x32xf32>, vector<32x128xf32>, vector<32x128xf32> -> vector<32x128xf32>
    %29 = arith.addf %23, %28 : vector<32x128xf32>
    %cst_22 = arith.constant dense<0xFF800000> : vector<32xf32>
    %30 = vector.multi_reduction <maximumf>, %29, %cst_22 [1] : vector<32x128xf32> to vector<32xf32>
    %31 = vector.shape_cast %30 : vector<32xf32> to vector<32x1xf32>
    %32 = vector.broadcast %31 : vector<32x1xf32> to vector<32x128xf32>
    %33 = arith.subf %29, %32 : vector<32x128xf32>
    %34 = math.exp %33 : vector<32x128xf32>
    %c0_23 = arith.constant 0 : index
    %c0_24 = arith.constant 0 : index
    %35 = vector.load %arg8[%c0_23, %c0_24] : memref<128x32xf32, #tpu.memory_space<vmem>>, vector<128x32xf32>
    %cst_25 = arith.constant dense<0.000000e+00> : vector<128x32xf32>
    %36 = tpu.matmul %35, %8, %cst_25 {dimension_numbers = #tpu.dot_dimension_numbers<[1], [0], [0], [1], [0, 0, 1, 1], [], []>} : vector<128x32xf32>, vector<32x32xf32>, vector<128x32xf32> -> vector<128x32xf32>
    %37 = arith.truncf %36 : vector<128x32xf32> to vector<128x32xbf16>
    %c0_26 = arith.constant 0 : index
    %c0_27 = arith.constant 0 : index
    %38 = vector.load %arg10[%c0_26, %c0_27] : memref<128x32xbf16, #tpu.memory_space<vmem>>, vector<128x32xbf16>
    %39 = arith.mulf %37, %38 : vector<128x32xbf16>
    %40 = arith.truncf %34 : vector<32x128xf32> to vector<32x128xbf16>
    %cst_28 = arith.constant dense<0.000000e+00> : vector<32x32xf32>
    %41 = tpu.matmul %40, %39, %cst_28 {dimension_numbers = #tpu.dot_dimension_numbers<[1], [0], [0], [1], [0, 0, 1, 1], [], []>} : vector<32x128xbf16>, vector<128x32xbf16>, vector<32x32xf32> -> vector<32x32xf32>
    %c0_29 = arith.constant 0 : index
    %c0_30 = arith.constant 0 : index
    %42 = vector.load %arg9[%c0_29, %c0_30] : memref<128x32xf32, #tpu.memory_space<vmem>>, vector<128x32xf32>
    %cst_31 = arith.constant dense<0.000000e+00> : vector<32x32xf32>
    %43 = tpu.matmul %34, %42, %cst_31 {dimension_numbers = #tpu.dot_dimension_numbers<[1], [0], [0], [1], [0, 0, 1, 1], [], []>} : vector<32x128xf32>, vector<128x32xf32>, vector<32x32xf32> -> vector<32x32xf32>
    %44 = tpu.reciprocal %43 {approx = true} : vector<32x32xf32> -> vector<32x32xf32>
    %45 = arith.mulf %41, %44 : vector<32x32xf32>
    %c0_32 = arith.constant 0 : index
    %c0_33 = arith.constant 0 : index
    %46 = vector.load %arg11[%c0_32, %c0_33] : memref<32x64xf32, #tpu.memory_space<vmem>>, vector<32x64xf32>
    %cst_34 = arith.constant dense<0.000000e+00> : vector<32x64xf32>
    %47 = tpu.matmul %45, %46, %cst_34 {dimension_numbers = #tpu.dot_dimension_numbers<[1], [0], [0], [1], [0, 0, 1, 1], [], []>} : vector<32x32xf32>, vector<32x64xf32>, vector<32x64xf32> -> vector<32x64xf32>
    %c0_35 = arith.constant 0 : index
    %c0_36 = arith.constant 0 : index
    %48 = vector.load %arg12[%c0_35, %c0_36] : memref<1x64xf32, #tpu.memory_space<vmem>>, vector<1x64xf32>
    %49 = vector.broadcast %48 : vector<1x64xf32> to vector<32x64xf32>
    %50 = arith.addf %47, %49 : vector<32x64xf32>
    %cst_37 = arith.constant 5.000000e-01 : f32
    %51 = vector.broadcast %cst_37 : f32 to vector<32x64xf32>
    %52 = arith.mulf %51, %50 : vector<32x64xf32>
    %cst_38 = arith.constant 0.707106769 : f32
    %53 = vector.broadcast %cst_38 : f32 to vector<32x64xf32>
    %54 = arith.mulf %50, %53 : vector<32x64xf32>
    %55 = math.absf %54 : vector<32x64xf32>
    %cst_39 = arith.constant 0.327591091 : f32
    %56 = vector.broadcast %cst_39 : f32 to vector<32x64xf32>
    %57 = arith.mulf %56, %55 : vector<32x64xf32>
    %cst_40 = arith.constant 1.000000e+00 : f32
    %58 = vector.broadcast %cst_40 : f32 to vector<32x64xf32>
    %59 = arith.addf %58, %57 : vector<32x64xf32>
    %cst_41 = arith.constant 1.000000e+00 : f32
    %60 = vector.broadcast %cst_41 : f32 to vector<32x64xf32>
    %61 = arith.divf %60, %59 : vector<32x64xf32>
    %cst_42 = arith.constant 1.06140542 : f32
    %62 = vector.broadcast %cst_42 : f32 to vector<32x64xf32>
    %63 = arith.mulf %62, %61 : vector<32x64xf32>
    %cst_43 = arith.constant -1.45315206 : f32
    %64 = vector.broadcast %cst_43 : f32 to vector<32x64xf32>
    %65 = arith.addf %63, %64 : vector<32x64xf32>
    %66 = arith.mulf %65, %61 : vector<32x64xf32>
    %cst_44 = arith.constant 1.42141378 : f32
    %67 = vector.broadcast %cst_44 : f32 to vector<32x64xf32>
    %68 = arith.addf %66, %67 : vector<32x64xf32>
    %69 = arith.mulf %68, %61 : vector<32x64xf32>
    %cst_45 = arith.constant -0.284496725 : f32
    %70 = vector.broadcast %cst_45 : f32 to vector<32x64xf32>
    %71 = arith.addf %69, %70 : vector<32x64xf32>
    %72 = arith.mulf %71, %61 : vector<32x64xf32>
    %cst_46 = arith.constant 0.254829586 : f32
    %73 = vector.broadcast %cst_46 : f32 to vector<32x64xf32>
    %74 = arith.addf %72, %73 : vector<32x64xf32>
    %75 = arith.mulf %74, %61 : vector<32x64xf32>
    %cst_47 = arith.constant 0.000000e+00 : f32
    %76 = vector.broadcast %cst_47 : f32 to vector<32x64xf32>
    %77 = arith.subf %76, %55 : vector<32x64xf32>
    %78 = arith.mulf %77, %55 : vector<32x64xf32>
    %79 = math.exp %78 : vector<32x64xf32>
    %80 = arith.mulf %75, %79 : vector<32x64xf32>
    %cst_48 = arith.constant 1.000000e+00 : f32
    %81 = vector.broadcast %cst_48 : f32 to vector<32x64xf32>
    %82 = arith.subf %81, %80 : vector<32x64xf32>
    %cst_49 = arith.constant 0.000000e+00 : f32
    %83 = vector.broadcast %cst_49 : f32 to vector<32x64xf32>
    %84 = arith.cmpf oge, %54, %83 : vector<32x64xf32>
    %cst_50 = arith.constant 0.000000e+00 : f32
    %85 = vector.broadcast %cst_50 : f32 to vector<32x64xf32>
    %86 = arith.subf %85, %82 : vector<32x64xf32>
    %87 = arith.select %84, %82, %86 : vector<32x64xi1>, vector<32x64xf32>
    %cst_51 = arith.constant 1.000000e+00 : f32
    %88 = vector.broadcast %cst_51 : f32 to vector<32x64xf32>
    %89 = arith.addf %88, %87 : vector<32x64xf32>
    %90 = arith.mulf %52, %89 : vector<32x64xf32>
    %c0_52 = arith.constant 0 : index
    %c0_53 = arith.constant 0 : index
    %91 = vector.load %arg13[%c0_52, %c0_53] : memref<64x32xf32, #tpu.memory_space<vmem>>, vector<64x32xf32>
    %cst_54 = arith.constant dense<0.000000e+00> : vector<32x32xf32>
    %92 = tpu.matmul %90, %91, %cst_54 {dimension_numbers = #tpu.dot_dimension_numbers<[1], [0], [0], [1], [0, 0, 1, 1], [], []>} : vector<32x64xf32>, vector<64x32xf32>, vector<32x32xf32> -> vector<32x32xf32>
    %c0_55 = arith.constant 0 : index
    %c0_56 = arith.constant 0 : index
    %93 = vector.load %arg14[%c0_55, %c0_56] : memref<1x32xf32, #tpu.memory_space<vmem>>, vector<1x32xf32>
    %94 = vector.broadcast %93 : vector<1x32xf32> to vector<32x32xf32>
    %95 = arith.addf %92, %94 : vector<32x32xf32>
    %c0_57 = arith.constant 0 : index
    %c0_58 = arith.constant 0 : index
    %c0_59 = arith.constant 0 : index
    %96 = vector.load %arg15[%c0_57, %c0_58, %c0_59] : memref<1x32x32xf32, #tpu.memory_space<vmem>>, vector<1x32x32xf32>
    %97 = vector.shape_cast %96 : vector<1x32x32xf32> to vector<32x32xf32>
    %98 = vector.shape_cast %95 : vector<32x32xf32> to vector<1x32x32xf32>
    tpu.vector_store %arg15[%c0_57, %c0_58, %c0_59], %98 {strides = array<i32>} : memref<1x32x32xf32, #tpu.memory_space<vmem>>, vector<1x32x32xf32>,
    return
  }
  func.func @transform_0(%arg0: i32) -> (i32, i32, i32) {
    %c0_i32 = arith.constant 0 : i32
    %c0_i32_0 = arith.constant 0 : i32
    %c0_i32_1 = arith.constant 0 : i32
    return %arg0, %c0_i32, %c0_i32_0 : i32, i32, i32
  }
  func.func @transform_1(%arg0: i32) -> (i32, i32, i32) {
    %c0_i32 = arith.constant 0 : i32
    %c0_i32_0 = arith.constant 0 : i32
    %c0_i32_1 = arith.constant 0 : i32
    return %arg0, %c0_i32, %c0_i32_0 : i32, i32, i32
  }
  func.func @transform_2(%arg0: i32) -> (i32, i32) {
    %c0_i32 = arith.constant 0 : i32
    %c0_i32_0 = arith.constant 0 : i32
    %c0_i32_1 = arith.constant 0 : i32
    return %c0_i32, %c0_i32_0 : i32, i32
  }
  func.func @transform_3(%arg0: i32) -> (i32, i32) {
    %c0_i32 = arith.constant 0 : i32
    %c0_i32_0 = arith.constant 0 : i32
    %c0_i32_1 = arith.constant 0 : i32
    return %c0_i32, %c0_i32_0 : i32, i32
  }
  func.func @transform_4(%arg0: i32) -> (i32, i32) {
    %c0_i32 = arith.constant 0 : i32
    %c0_i32_0 = arith.constant 0 : i32
    %c0_i32_1 = arith.constant 0 : i32
    return %c0_i32, %c0_i32_0 : i32, i32
  }
  func.func @transform_5(%arg0: i32) -> (i32, i32) {
    %c0_i32 = arith.constant 0 : i32
    %c0_i32_0 = arith.constant 0 : i32
    %c0_i32_1 = arith.constant 0 : i32
    return %c0_i32, %c0_i32_0 : i32, i32
  }
  func.func @transform_6(%arg0: i32) -> (i32, i32) {
    %c0_i32 = arith.constant 0 : i32
    %c0_i32_0 = arith.constant 0 : i32
    %c0_i32_1 = arith.constant 0 : i32
    return %c0_i32, %c0_i32_0 : i32, i32
  }
  func.func @transform_7(%arg0: i32) -> (i32, i32) {
    %c0_i32 = arith.constant 0 : i32
    %c0_i32_0 = arith.constant 0 : i32
    %c0_i32_1 = arith.constant 0 : i32
    return %c0_i32, %c0_i32_0 : i32, i32
  }
  func.func @transform_8(%arg0: i32) -> (i32, i32) {
    %c0_i32 = arith.constant 0 : i32
    %c0_i32_0 = arith.constant 0 : i32
    %c0_i32_1 = arith.constant 0 : i32
    return %c0_i32, %c0_i32_0 : i32, i32
  }
  func.func @transform_9(%arg0: i32) -> (i32, i32) {
    %c0_i32 = arith.constant 0 : i32
    %c0_i32_0 = arith.constant 0 : i32
    %c0_i32_1 = arith.constant 0 : i32
    return %c0_i32, %c0_i32_0 : i32, i32
  }
  func.func @transform_10(%arg0: i32) -> (i32, i32) {
    %c0_i32 = arith.constant 0 : i32
    %c0_i32_0 = arith.constant 0 : i32
    %c0_i32_1 = arith.constant 0 : i32
    return %c0_i32, %c0_i32_0 : i32, i32
  }
  func.func @transform_11(%arg0: i32) -> (i32, i32) {
    %c0_i32 = arith.constant 0 : i32
    %c0_i32_0 = arith.constant 0 : i32
    %c0_i32_1 = arith.constant 0 : i32
    return %c0_i32, %c0_i32_0 : i32, i32
  }
  func.func @transform_12(%arg0: i32) -> (i32, i32) {
    %c0_i32 = arith.constant 0 : i32
    %c0_i32_0 = arith.constant 0 : i32
    %c0_i32_1 = arith.constant 0 : i32
    return %c0_i32, %c0_i32_0 : i32, i32
  }
  func.func @transform_13(%arg0: i32) -> (i32, i32) {
    %c0_i32 = arith.constant 0 : i32
    %c0_i32_0 = arith.constant 0 : i32
    %c0_i32_1 = arith.constant 0 : i32
    return %c0_i32, %c0_i32_0 : i32, i32
  }
  func.func @transform_14(%arg0: i32) -> (i32, i32, i32) {
    %c0_i32 = arith.constant 0 : i32
    %c0_i32_0 = arith.constant 0 : i32
    %c0_i32_1 = arith.constant 0 : i32
    return %arg0, %c0_i32, %c0_i32_0 : i32, i32, i32
  }
}

</mosaic_0001>

<bundles_post_ra>
// kernel: gat_forward.1
= control target key start
LH: loop header
LB: loop body
LE: loop exit
PB: predicated region body
PF: predicated region fallthrough
CT: control target
= control target key end

     0   :  { %s2922_s0 = inlined_call_operand.vmem [shape: f32[2,32,32], index: 0, kind: input, shape index: {}]   ;;  %s2923_s1 = inlined_call_operand.vmem [shape: f32[2,32,32], index: 1, kind: input, shape index: {}]   ;;  %s2924_s2 = inlined_call_operand.vmem [shape: f32[32,32], index: 2, kind: input, shape index: {}]   ;;  %s2925_s3 = inlined_call_operand.vmem [shape: f32[1,32], index: 3, kind: input, shape index: {}]   ;;  %s2926_s4 = inlined_call_operand.vmem [shape: f32[32,256], index: 4, kind: input, shape index: {}]   ;;  %s2927_s5 = inlined_call_operand.vmem [shape: f32[1,128], index: 5, kind: input, shape index: {}]   ;;  %s2928_s6 = inlined_call_operand.vmem [shape: f32[32,128], index: 6, kind: input, shape index: {}]   ;;  %s2929_s7 = inlined_call_operand.vmem [shape: f32[128,32], index: 7, kind: input, shape index: {}]   ;;  %s2930_s8 = inlined_call_operand.vmem [shape: f32[128,32], index: 8, kind: input, shape index: {}]   ;;  %s2931_s9 = inlined_call_operand.vmem [shape: bf16[128,32], index: 9, kind: input, shape index: {}]   ;;  %s2932_s10 = inlined_call_operand.vmem [shape: f32[32,64], index: 10, kind: input, shape index: {}]   ;;  %s2933_s11 = inlined_call_operand.vmem [shape: f32[1,64], index: 11, kind: input, shape index: {}]   ;;  %s2934_s12 = inlined_call_operand.vmem [shape: f32[64,32], index: 12, kind: input, shape index: {}]   ;;  %s2935_s13 = inlined_call_operand.vmem [shape: f32[1,32], index: 13, kind: input, shape index: {}]   ;;  %s2936_s14 = inlined_call_operand.hbm [shape: f32[2,32,32], index: 14, kind: output, shape index: {}]  }
   0x1   :  { %2941 = sst [smem:[#allocation8_spill]] %s2922_s0 }
   0x2   :  { %19 = vsyncpa [#allocation3], 0 }
   0x3   :  { %21 = vsyncpa [#allocation3 + $0x1], 0  ;;  %s2489_s29 = smov 0   ;;  %s2491_s30 = smov 0  }
   0x4   :  { %s2493_s15 = smov 0   ;;  %s2495_s16 = smov 0  }
   0x5 LB: > { %2942 = sst [smem:[#allocation5_spill]] %s2403_s15  ;;  %s2510_s17 = sadd.s32 4294967295, %s2407_s16   ;;  %s2407_s16 = sphi %s2495_s16, %s2949_s16   ;;  %s2403_s15 = sphi %s2493_s15, %s2951_s15   ;;  %s2399_s30 = sphi %s2491_s30, %s2953_s30   ;;  %s2395_s29 = sphi %s2489_s29, %s2952_s29  }
   0x6   : > { %s1831_s18 = sadd.s32 4294967294, %s2407_s16   ;;  %s2514_s19 = sadd.s32 1, %s2407_s16  }
   0x7   : > { %2943 = sst [smem:[#allocation6_spill]] %s2514_s19  ;;  %s338_s20 = sadd.s32 1, %s2403_s15 }
   0x8   : > { %s335_s21 = ssub.s32 %s2407_s16, %s2514_s19  ;;  %p348_p0 = scmp.ne.s32.totalorder %s2403_s15, %s2399_s30 }
   0x9   : > { %p336_p1 = scmp.eq.s32.totalorder %s335_s21, 0  ;;  %p349_p2 = scmp.eq.s32.totalorder %s2510_s17, 1 }
   0xa   : > { %p354_p3 = scmp.ne.s32.totalorder %s2399_s30, %s2395_s29  ;;  %p355_p4 = scmp.eq.s32.totalorder %s1831_s18, 1 }
   0xb   : > { %s2525_s22 = scalar_select %p336_p1, %s2403_s15, %s338_s20  }
   0xc   : > { %p2527_p5 = por %p349_p2, %p348_p0  ;;  %p2531_p6 = por %p355_p4, %p354_p3 }
   0xd   : > { %2944 = sst [smem:[#allocation7_spill]] %s2525_s22  ;;  %p1834_p7 = scmp.ge.s32.totalorder %s2407_s16, 1 }
   0xe   : > { %p425_p8 = scmp.lt.s32.totalorder %s2407_s16, 3 }
  0x10   : > { %p426_p9 = pnand %p1834_p7, %p425_p8 }
  0x11   : > { %v495_v0 = vld [vmem:[%s2924_s2] sm:$0xff] (!%p426_p9)  ;;  %v496_v1 = vld [vmem:[%s2924_s2 + $0x8] sm:$0xff] (!%p426_p9)  ;;  %v497_v2 = vld [vmem:[%s2924_s2 + $0x10] sm:$0xff] (!%p426_p9)  ;;  %p476_p10 = scmp.lt.s32.totalorder (!%p426_p9), %s2510_s17, 1  ;;  %vm506_vm0 = vcmask (!%p426_p9), 261120   ;;  %s2947_s0 = sld [smem:[#allocation8_spill]] (!%p426_p9) }
  0x12   : > { %429 = sbr.rel (%p426_p9) target bundleno = 1588 (0x634), region = 76  ;;  %v2166_v3 = vpack.c.bf16 (!%p426_p9), %v496_v1, %v495_v0  ;;  %v498_v4 = vld [vmem:[%s2924_s2 + $0x18] sm:$0xff] (!%p426_p9)  ;;  %v605_v5 = vld [vmem:[%s2926_s4 + $0x8] sm:$0xff] (!%p426_p9)  ;;  %v604_v9 = vld [vmem:[%s2926_s4] sm:$0xff] (!%p426_p9)  ;;  %v2409_v22 = vmov (!%p426_p9), 0.0   ;;  %v2410_v34 = vmov (!%p426_p9), 1.0  }
  0x13   : > { %v607_v6 = vld [vmem:[%s2926_s4 + $0x18] sm:$0xff] (!%p426_p9)  ;;  %v2170_v7 = vpack.c.bf16 (!%p426_p9), %v498_v4, %v497_v2  ;;  %v606_v10 = vld [vmem:[%s2926_s4 + $0x10] sm:$0xff] (!%p426_p9)  ;;  %v609_v16 = vld [vmem:[%s2926_s4 + $0x28] sm:$0xff] (!%p426_p9)  ;;  %688 = vmatprep.mubr.f32.mxu1 (!%p426_p9), %v2409_v22  ;;  %vm1641_vm4 = vcmask (!%p426_p9), 523264   ;;  %s2411_s21 = smov (!%p426_p9), [#allocation2]  }
  0x14   : > { %v2174_v8 = vpack.c.bf16 (!%p426_p9), %v607_v6, %v605_v5  ;;  %2167 = vmatprep.subr.bf16.mxu0 (!%p426_p9), %v2166_v3  ;;  %v2176_v11 = vpack.c.bf16 (!%p426_p9), %v606_v10, %v604_v9  ;;  %v611_v17 = vld [vmem:[%s2926_s4 + $0x38] sm:$0xff] (!%p426_p9)  ;;  %v608_v19 = vld [vmem:[%s2926_s4 + $0x20] sm:$0xff] (!%p426_p9)  ;;  %v610_v20 = vld [vmem:[%s2926_s4 + $0x30] sm:$0xff] (!%p426_p9) }
  0x15   : > { %2169 = vmatpush3.bf16.msra.mxu0 (!%p426_p9), %v2166_v3  ;;  %v2178_v18 = vpack.c.bf16 (!%p426_p9), %v611_v17, %v609_v16  ;;  %v2180_v21 = vpack.c.bf16 (!%p426_p9), %v610_v20, %v608_v19  ;;  %v1840_v23 = vld [vmem:[%s2925_s3] ss:$0 sm:$0xff] (!%p426_p9)  ;;  %v962_v36 = vld [vmem:[%s2929_s7 + $0x8] sm:$0xff] (!%p426_p9)  ;;  %v963_v37 = vld [vmem:[%s2929_s7 + $0x10] sm:$0xff] (!%p426_p9) }
  0x16   : > { %2175 = vmatprep.subr.bf16.mxu1 (!%p426_p9), %v2174_v8  ;;  %2171 = vmatprep.subr.bf16.mxu0 (!%p426_p9), %v2170_v7  ;;  %v961_v35 = vld [vmem:[%s2929_s7] sm:$0xff] (!%p426_p9)  ;;  %v964_v38 = vld [vmem:[%s2929_s7 + $0x18] sm:$0xff] (!%p426_p9)  ;;  %v966_v40 = vld [vmem:[%s2929_s7 + $0x28] sm:$0xff] (!%p426_p9) }
  0x17   : > { %2177 = vmatpush1.bf16.msra.mxu1 (!%p426_p9), %v2176_v11  ;;  %v965_v39 = vld [vmem:[%s2929_s7 + $0x20] sm:$0xff] (!%p426_p9)  ;;  %v967_v41 = vld [vmem:[%s2929_s7 + $0x30] sm:$0xff] (!%p426_p9)  ;;  %v968_v42 = vld [vmem:[%s2929_s7 + $0x38] sm:$0xff] (!%p426_p9) }
  0x18   : > { %2179 = vmatprep.subr.bf16.mxu1 (!%p426_p9), %v2178_v18  ;;  %v969_v43 = vld [vmem:[%s2929_s7 + $0x40] sm:$0xff] (!%p426_p9)  ;;  %v970_v44 = vld [vmem:[%s2929_s7 + $0x48] sm:$0xff] (!%p426_p9)  ;;  %v971_v45 = vld [vmem:[%s2929_s7 + $0x50] sm:$0xff] (!%p426_p9) }
  0x19   : > { %s2557_s27 = scalar_select %p476_p10, %s2510_s17, 1  ;;  %2173 = vmatpush3.bf16.msra.mxu0 %v2170_v7  ;;  %v972_v46 = vld [vmem:[%s2929_s7 + $0x58] sm:$0xff]  ;;  %v973_v47 = vld [vmem:[%s2929_s7 + $0x60] sm:$0xff]  ;;  %v974_v48 = vld [vmem:[%s2929_s7 + $0x68] sm:$0xff] }
  0x1a   : > { %v975_v49 = vld [vmem:[%s2929_s7 + $0x70] sm:$0xff]  ;;  %v976_v50 = vld [vmem:[%s2929_s7 + $0x78] sm:$0xff]  ;;  %v713_v53 = vld [vmem:[%s2928_s6] sm:$0xff] }
  0x1b   : > { %s2940_s15 = sshll.u32 %s2557_s27, 5  ;;  %2181 = vmatpush1.bf16.msra.mxu1 %v2180_v21  ;;  %v714_v54 = vld [vmem:[%s2928_s6 + $0x8] sm:$0xff]  ;;  %v715_v62 = vld [vmem:[%s2928_s6 + $0x10] sm:$0xff]  ;;  %v716_v63 = vld [vmem:[%s2928_s6 + $0x18] sm:$0xff]  ;;  %s2948_s20 = sshll.u32 %s2557_s27, 5 }
  0x1c   : > { %s480_s25 = scalar_lea.vmem %s2947_s0, %s2940_s15  ;;  %v2190_v4 = vpack.c.bf16 %v714_v54, %v713_v53  ;;  %v2194_v9 = vpack.c.bf16 %v716_v63, %v715_v62  ;;  %v1301_v20 = vld [vmem:[%s2930_s8] sm:$0xff]  ;;  %v1302_v21 = vld [vmem:[%s2930_s8 + $0x8] sm:$0xff]  ;;  %s1903_s15 = sshll.u32 %s2510_s17, 9 }
  0x1d   : > { %v487_v12 = vld [vmem:[%s480_s25] sm:$0xff]  ;;  %v488_v13 = vld [vmem:[%s480_s25 + $0x8] sm:$0xff]  ;;  %v489_v14 = vld [vmem:[%s480_s25 + $0x10] sm:$0xff]  ;;  %s2877_s22 = scalar_lea.hbm %s2936_s14, %s1903_s15 }
  0x1e   : > { %2006 = vmatprep.mubr.msk.f32.mxu0 %vm506_vm0, %v487_v12  ;;  %v490_v15 = vld [vmem:[%s480_s25 + $0x18] sm:$0xff]  ;;  %s485_s25 = scalar_lea.vmem %s2923_s1, %s2948_s20  ;;  %s473_s20 = sand.u32 1, %s2399_s30  }
  0x1f   : > { %2007 = vmatmul.mubr.msk.f32.vlgmr.msra.gmra.mrb[0].mxu0 %vm506_vm0, %v488_v13  ;;  %v491_v6 = vld [vmem:[%s485_s25] sm:$0xff]  ;;  %v492_v7 = vld [vmem:[%s485_s25 + $0x8] sm:$0xff]  ;;  %v493_v10 = vld [vmem:[%s485_s25 + $0x10] sm:$0xff]  ;;  %s1835_s19 = sshll.u32 %s473_s20, 5  ;;  %s2881_s17 = scalar_lea.sflag [#allocation3], %s473_s20 }
  0x20   : > { %2009 = vmatprep.mubr.msk.f32.mxu0 %vm506_vm0, %v489_v14  ;;  %v1854_v8 = vadd.f32 -1.0, %v491_v6  ;;  %v1855_v11 = vadd.f32 -1.0, %v492_v7  ;;  %v1856_v13 = vadd.f32 -1.0, %v493_v10  ;;  %v494_v14 = vld [vmem:[%s485_s25 + $0x18] sm:$0xff]  ;;  %s475_s27 = scalar_lea.vmem [#allocation2], %s1835_s19  ;;  %s2349_s25 = sshll.u32 %s2411_s21, 4  ;;  %s2350_s25 = int_to_ptr.vmem [resolvable:$false] %s2349_s25 }
  0x21   : > { %v1857_v16 = vadd.f32 -1.0, %v494_v14  ;;  %v1310_v14 = vld [vmem:[%s2930_s8 + $0x48] sm:$0xff]  ;;  %s1757_s26 = sshll.u32 %s475_s27, 4  ;;  %s2351_s0 = scalar_lea.vmem %s2350_s25, 1024  ;;  %s2872_s26 = int_to_ptr.vmem [resolvable:$true] %s1757_s26 }
  0x22   : > { %v836_v12 = vmul.f32 1e+30, %v1854_v8  ;;  %v838_v17 = vmul.f32 1e+30, %v1856_v13  ;;  %v1309_v13 = vld [vmem:[%s2930_s8 + $0x40] sm:$0xff]  ;;  %s2345_s19 = scalar_lea.vmem %s2872_s26, 512  ;;  %p2352_p0 = scmp.lt.s32.totalorder %s2872_s26, %s2350_s25 }
  0x23   : > { %2010 = vmatmul.mubr.msk.f32.gmra.mrb[2].mxu0 %vm506_vm0, %v490_v15  ;;  %v837_v15 = vmul.f32 1e+30, %v1855_v11  ;;  %v839_v18 = vmul.f32 1e+30, %v1857_v16  ;;  %v2308_v16 = vld [vmem:[%s2931_s9 + $0x18] sm:$0xff]   ;;  %p2346_p11 = scmp.ne.s32.totalorder %s2872_s26, %s2345_s19  ;;  %p2353_p1 = scmp.lt.s32.totalorder %s2351_s0, %s2345_s19 }
  0x24   : > { %2020 = vmatprep.mubr.msk.f32.mxu0 %vm506_vm0, %v2410_v34 }
  0x25   : > { %p2347_p12 = pnand %p2346_p11, %p2527_p5  ;;  %p2354_p2 = por %p2353_p1, %p2352_p0 }
  0x27   : > { %p2348_p13 = pneg %p2347_p12 }
  0x29   : > { %p2355_p3 = pnand %p2354_p2, %p2348_p13 }
  0xf2   : > { %v2008_v24 = vpop.f32.mrb[0].mxu0 }
  0xf3   : > { %v591_v25 = vadd.f32 %v2008_v24, %v1840_v23  ;;  %v585_v26 = vpop.f32.mrb[1].mxu0 }
  0xf4   : > { %v586_v27 = vadd.f32 %v1840_v23, %v585_v26  ;;  %v1304_v26 = vld [vmem:[%s2930_s8 + $0x18] sm:$0xff] }
  0xf6   : > { %v2198_v28 = vpack.c.bf16 %v591_v25, %v586_v27  ;;  %1845 = vmatmul.mubr.msk.f32.vlgmr.msra.gmra.mrb[0].mxu1 %vm506_vm0, %v586_v27  ;;  %v2011_v29 = vpop.f32.mrb[2].mxu0 }
  0xf7   : > { %v601_v30 = vadd.f32 %v2011_v29, %v1840_v23  ;;  %v595_v31 = vpop.f32.mrb[3].mxu0  ;;  %694 = vmatprep.mubr.f32.mxu1 %v2409_v22 }
  0xf8   : > { %2199 = vmatprep.subr.bf16.mxu1 %v2198_v28  ;;  %v596_v32 = vadd.f32 %v1840_v23, %v595_v31  ;;  %v2206_v23 = vpack.c.bf16 %v1302_v21, %v1301_v20  ;;  %v1305_v31 = vld [vmem:[%s2930_s8 + $0x20] sm:$0xff]  ;;  %v1311_v21 = vld [vmem:[%s2930_s8 + $0x50] sm:$0xff] }
  0xf9   : > { %2201 = vmatpush3.bf16.msra.mxu1 %v2198_v28 }
  0xfa   : > { %v2202_v33 = vpack.c.bf16 %v601_v30, %v596_v32  ;;  %1846 = vmatmul.mubr.msk.f32.gmra.mrb[2].mxu1 %vm506_vm0, %v591_v25  ;;  %v1303_v25 = vld [vmem:[%s2930_s8 + $0x10] sm:$0xff] }
  0xfb   : > { %700 = vmatprep.mubr.f32.mxu1 %v2409_v22  ;;  %v2210_v29 = vpack.c.bf16 %v1304_v26, %v1303_v25 }
  0xfc   : > { %2203 = vmatprep.subr.bf16.mxu1 %v2202_v33 }
  0xfd   : > { %2205 = vmatpush3.bf16.msra.mxu1 %v2202_v33 }
  0xfe   : > { %1847 = vmatmul.mubr.msk.f32.gmra.mrb[4].mxu1 %vm506_vm0, %v596_v32  ;;  %v1306_v32 = vld [vmem:[%s2930_s8 + $0x28] sm:$0xff]  ;;  %2207 = vmatprep.subr.bf16.mxu1 %v2206_v23 }
  0xff   : > { %706 = vmatprep.mubr.f32.mxu1 %v2409_v22  ;;  %v2305_v22 = vld [vmem:[%s2931_s9] sm:$0xff]  }
 0x102   : > { %1848 = vmatmul.mubr.msk.f32.gmra.mrb[6].mxu1 %vm506_vm0, %v601_v30  ;;  %v2306_v30 = vld [vmem:[%s2931_s9 + $0x8] sm:$0xff]  }
 0x103   : > { %2048 = vmatprep.mubr.msk.f32.mxu1 %vm506_vm0, %v961_v35 }
 0x106   : > { %2049 = vmatmul.mubr.msk.f32.vlgmr.msra.gmra.mrb[8].mxu1 %vm506_vm0, %v962_v36 }
 0x107   : > { %2051 = vmatprep.mubr.msk.f32.mxu1 %vm506_vm0, %v963_v37  ;;  %2209 = vmatpush3.bf16.msra.mxu1 %v2206_v23  ;;  %v2307_v37 = vld [vmem:[%s2931_s9 + $0x10] sm:$0xff]  }
 0x108   : > { %2211 = vmatprep.subr.bf16.mxu1 %v2210_v29 }
 0x10a   : > { %2052 = vmatmul.mubr.msk.f32.gmra.mrb[10].mxu1 %vm506_vm0, %v964_v38  ;;  %v2214_v38 = vpack.c.bf16 %v1306_v32, %v1305_v31  ;;  %v2310_v32 = vld [vmem:[%s2931_s9 + $0x28] sm:$0xff]  }
 0x10b   : > { %2054 = vmatprep.mubr.msk.f32.mxu1 %vm506_vm0, %v965_v39  ;;  %2213 = vmatpush3.bf16.msra.mxu1 %v2210_v29  ;;  %v1313_v29 = vld [vmem:[%s2930_s8 + $0x60] sm:$0xff] }
 0x10c   : > { %2215 = vmatprep.subr.bf16.mxu1 %v2214_v38 }
 0x10e   : > { %2055 = vmatmul.mubr.msk.f32.gmra.mrb[12].mxu1 %vm506_vm0, %v966_v40 }
 0x10f   : > { %2057 = vmatprep.mubr.msk.f32.mxu1 %vm506_vm0, %v967_v41  ;;  %2217 = vmatpush3.bf16.msra.mxu1 %v2214_v38  ;;  %v1316_v38 = vld [vmem:[%s2930_s8 + $0x78] sm:$0xff] }
 0x112   : > { %2058 = vmatmul.mubr.msk.f32.gmra.mrb[14].mxu1 %vm506_vm0, %v968_v42 }
 0x113   : > { %2060 = vmatprep.mubr.msk.f32.mxu1 %vm506_vm0, %v969_v43  ;;  %v1307_v43 = vld [vmem:[%s2930_s8 + $0x30] sm:$0xff] }
 0x116   : > { %2061 = vmatmul.mubr.msk.f32.gmra.mrb[16].mxu1 %vm506_vm0, %v970_v44  ;;  %v1308_v44 = vld [vmem:[%s2930_s8 + $0x38] sm:$0xff] }
 0x117   : > { %2063 = vmatprep.mubr.msk.f32.mxu1 %vm506_vm0, %v971_v45 }
 0x11a   : > { %2064 = vmatmul.mubr.msk.f32.gmra.mrb[18].mxu1 %vm506_vm0, %v972_v46  ;;  %v2218_v46 = vpack.c.bf16 %v1308_v44, %v1307_v43  ;;  %v2312_v44 = vld [vmem:[%s2931_s9 + $0x38] sm:$0xff]  }
 0x11b   : > { %2066 = vmatprep.mubr.msk.f32.mxu1 %vm506_vm0, %v973_v47 }
 0x11c   : > { %2219 = vmatprep.subr.bf16.mxu1 %v2218_v46 }
 0x11d   : > { %2221 = vmatpush3.bf16.msra.mxu1 %v2218_v46 }
 0x11e   : > { %2067 = vmatmul.mubr.msk.f32.gmra.mrb[20].mxu1 %vm506_vm0, %v974_v48  ;;  %v1853_v48 = vld [vmem:[%s2927_s5] ss:$0 sm:$0xff] }
 0x11f   : > { %2069 = vmatprep.mubr.msk.f32.mxu1 %vm506_vm0, %v975_v49 }
 0x122   : > { %2070 = vmatmul.mubr.msk.f32.gmra.mrb[22].mxu1 %vm506_vm0, %v976_v50 }
 0x1c9   : > { %v2660_v51 = vpop.f32.mrb[0].mxu1 }
 0x1ca   : > { %v692_v52 = vpop.f32.mrb[1].mxu1 }
 0x1cb   : > { %v717_v57 = vmul.f32 %v713_v53, %v692_v52 }
 0x1cd   : > { %v2668_v55 = vpop.f32.mrb[2].mxu1 }
 0x1ce   : > { %v698_v56 = vpop.f32.mrb[3].mxu1 }
 0x1cf   : > { %v718_v58 = vmul.f32 %v714_v54, %v698_v56 }
 0x1d1   : > { %v2182_v59 = vpack.c.bf16 %v718_v58, %v717_v57  ;;  %v2670_v60 = vpop.f32.mrb[4].mxu1 }
 0x1d2   : > { %v704_v61 = vpop.f32.mrb[5].mxu1 }
 0x1d3   : > { %2183 = vmatprep.subr.bf16.mxu0 %v2182_v59  ;;  %v719_v2 = vmul.f32 %v715_v62, %v704_v61 }
 0x1d4   : > { %2185 = vmatpush3.bf16.msra.mxu0 %v2182_v59 }
 0x1d5   : > { %v2678_v0 = vpop.f32.mrb[6].mxu1 }
 0x1d6   : > { %v710_v1 = vpop.f32.mrb[7].mxu1 }
 0x1d7   : > { %v720_v3 = vmul.f32 %v716_v63, %v710_v1 }
 0x1d9   : > { %v2186_v5 = vpack.c.bf16 %v720_v3, %v719_v2  ;;  %v2050_v19 = vpop.f32.mrb[8].mxu1 }
 0x1da   : > { %v1091_v24 = vpop.f32.mrb[9].mxu1 }
 0x1db   : > { %2187 = vmatprep.subr.bf16.mxu0 %v2186_v5  ;;  %v1170_v27 = vpack.c.bf16 %v2050_v19, %v1091_v24  ;;  %v2309_v24 = vld [vmem:[%s2931_s9 + $0x20] sm:$0xff]  }
 0x1dc   : > { %2189 = vmatpush3.bf16.msra.mxu0 %v2186_v5 }
 0x1dd   : > { %2191 = vmatprep.subr.bf16.mxu0 %v2190_v4  ;;  %v2053_v28 = vpop.f32.mrb[10].mxu1 }
 0x1de   : > { %v1101_v33 = vpop.f32.mrb[11].mxu1 }
 0x1df   : > { %2021 = vmatmul.mubr.msk.f32.vlgmr.msra.gmra.mrb[4].mxu0 %vm506_vm0, %v2410_v34  ;;  %v1171_v35 = vpack.c.bf16 %v2053_v28, %v1101_v33 }
 0x1e0   : > { %2193 = vmatpush3.bf16.msra.mxu0 %v2190_v4  ;;  %2023 = vmatprep.mubr.msk.f32.mxu0 %vm506_vm0, %v2410_v34 }
 0x1e1   : > { %2195 = vmatprep.subr.bf16.mxu0 %v2194_v9  ;;  %v2056_v36 = vpop.f32.mrb[12].mxu1  ;;  %v1243_v40 = vmul.bf16 %v2306_v30, %v1171_v35  ;;  %v1314_v30 = vld [vmem:[%s2930_s8 + $0x68] sm:$0xff] }
 0x1e2   : > { %v1111_v39 = vpop.f32.mrb[13].mxu1  ;;  %v2230_v33 = vpack.c.bf16 %v1314_v30, %v1313_v29  ;;  %v1630_v30 = vld [vmem:[%s2934_s12 + $0x20] sm:$0xff] }
 0x1e3   : > { %2024 = vmatmul.mubr.msk.f32.gmra.mrb[6].mxu0 %vm506_vm0, %v2410_v34  ;;  %v1242_v34 = vmul.bf16 %v2305_v22, %v1170_v27  ;;  %v1172_v41 = vpack.c.bf16 %v2056_v36, %v1111_v39  ;;  %v1312_v22 = vld [vmem:[%s2930_s8 + $0x58] sm:$0xff]  ;;  %v2311_v36 = vld [vmem:[%s2931_s9 + $0x30] sm:$0xff]  }
 0x1e4   : > { %2197 = vmatpush3.bf16.msra.mxu0 %v2194_v9  ;;  %2034 = vmatprep.mubr.msk.f32.mxu0 %vm506_vm0, %v836_v12  ;;  %v2226_v25 = vpack.c.bf16 %v1312_v22, %v1311_v21 }
 0x1e5   : > { %2072 = vmatprep.subr.bf16.mxu0 %v1242_v34  ;;  %v2059_v42 = vpop.f32.mrb[14].mxu1  ;;  %v1244_v45 = vmul.bf16 %v2307_v37, %v1172_v41  ;;  %v1315_v37 = vld [vmem:[%s2930_s8 + $0x70] sm:$0xff] }
 0x1e6   : > { %v1121_v12 = vpop.f32.mrb[15].mxu1 }
 0x1e7   : > { %2035 = vmatmul.mubr.msk.f32.vlgmr.msra.gmra.mrb[8].mxu0 %vm506_vm0, %v837_v15  ;;  %v1173_v15 = vpack.c.bf16 %v2059_v42, %v1121_v12 }
 0x1e8   : > { %2037 = vmatprep.mubr.msk.f32.mxu0 %vm506_vm0, %v838_v17  ;;  %2073 = vmatpush3.bf16.msra.mxu0 %v1242_v34  ;;  %v2222_v17 = vpack.c.bf16 %v1310_v14, %v1309_v13 }
 0x1e9   : > { %2074 = vmatprep.subr.bf16.mxu0 %v1243_v40  ;;  %v2062_v19 = vpop.f32.mrb[16].mxu1 }
 0x1ea   : > { %2223 = vmatprep.subr.bf16.mxu1 %v2222_v17  ;;  %v1131_v20 = vpop.f32.mrb[17].mxu1 }
 0x1eb   : > { %2038 = vmatmul.mubr.msk.f32.gmra.mrb[10].mxu0 %vm506_vm0, %v839_v18  ;;  %v1245_v18 = vmul.bf16 %v2308_v16, %v1173_v15  ;;  %2225 = vmatpush3.bf16.msra.mxu1 %v2222_v17  ;;  %v1174_v23 = vpack.c.bf16 %v2062_v19, %v1131_v20 }
 0x1ec   : > { %2075 = vmatpush3.bf16.msra.mxu0 %v1243_v40  ;;  %2227 = vmatprep.subr.bf16.mxu1 %v2226_v25  ;;  %v2234_v40 = vpack.c.bf16 %v1316_v38, %v1315_v37 }
 0x1ed   : > { %2076 = vmatprep.subr.bf16.mxu0 %v1244_v45  ;;  %v1246_v26 = vmul.bf16 %v2309_v24, %v1174_v23  ;;  %v2065_v27 = vpop.f32.mrb[18].mxu1  ;;  %v1626_v24 = vld [vmem:[%s2934_s12] sm:$0xff] }
 0x1ee   : > { %v1141_v28 = vpop.f32.mrb[19].mxu1 }
 0x1ef   : > { %2229 = vmatpush3.bf16.msra.mxu1 %v2226_v25  ;;  %v1175_v31 = vpack.c.bf16 %v2065_v27, %v1141_v28  ;;  %v1627_v25 = vld [vmem:[%s2934_s12 + $0x8] sm:$0xff]  ;;  %v1628_v27 = vld [vmem:[%s2934_s12 + $0x10] sm:$0xff]  ;;  %v1629_v28 = vld [vmem:[%s2934_s12 + $0x18] sm:$0xff] }
 0x1f0   : > { %2077 = vmatpush3.bf16.msra.mxu0 %v1244_v45  ;;  %2231 = vmatprep.subr.bf16.mxu1 %v2230_v33  ;;  %v2250_v29 = vpack.c.bf16 %v1629_v28, %v1628_v27 }
 0x1f1   : > { %2078 = vmatprep.subr.bf16.mxu0 %v1245_v18  ;;  %v1247_v34 = vmul.bf16 %v2310_v32, %v1175_v31  ;;  %v2068_v35 = vpop.f32.mrb[20].mxu1  ;;  %v1631_v31 = vld [vmem:[%s2934_s12 + $0x28] sm:$0xff] }
 0x1f2   : > { %v1151_v39 = vpop.f32.mrb[21].mxu1  ;;  %v2254_v32 = vpack.c.bf16 %v1631_v31, %v1630_v30 }
 0x1f3   : > { %2233 = vmatpush3.bf16.msra.mxu1 %v2230_v33  ;;  %v1176_v41 = vpack.c.bf16 %v2068_v35, %v1151_v39  ;;  %v1632_v33 = vld [vmem:[%s2934_s12 + $0x30] sm:$0xff] }
 0x1f4   : > { %2079 = vmatpush3.bf16.msra.mxu0 %v1245_v18  ;;  %2235 = vmatprep.subr.bf16.mxu1 %v2234_v40 }
 0x1f5   : > { %2080 = vmatprep.subr.bf16.mxu0 %v1246_v26  ;;  %v2071_v42 = vpop.f32.mrb[22].mxu1  ;;  %v1248_v45 = vmul.bf16 %v2311_v36, %v1176_v41  ;;  %v1886_v36 = vld [vmem:[%s2933_s11] ss:$0 sm:$0xff] }
 0x1f6   : > { %v1161_v43 = vpop.f32.mrb[23].mxu1 }
 0x1f7   : > { %v1177_v46 = vpack.c.bf16 %v2071_v42, %v1161_v43  ;;  %2237 = vmatpush3.bf16.msra.mxu1 %v2234_v40 }
 0x1f8   : > { %2081 = vmatpush3.bf16.msra.mxu0 %v1246_v26  ;;  %v2246_v26 = vpack.c.bf16 %v1627_v25, %v1626_v24 }
 0x1f9   : > { %2082 = vmatprep.subr.bf16.mxu0 %v1247_v34 }
 0x1fa   : > { %2247 = vmatprep.subr.bf16.mxu1 %v2246_v26 }
 0x1fc   : > { %2083 = vmatpush3.bf16.msra.mxu0 %v1247_v34  ;;  %v1633_v34 = vld [vmem:[%s2934_s12 + $0x38] sm:$0xff] }
 0x1fd   : > { %2084 = vmatprep.subr.bf16.mxu0 %v1248_v45  ;;  %v2258_v35 = vpack.c.bf16 %v1633_v34, %v1632_v33 }
 0x200   : > { %2085 = vmatpush3.bf16.msra.mxu0 %v1248_v45 }
 0x2b2   : > { %v2022_v47 = vpop.f32.mrb[4].mxu0 }
 0x2b3   : > { %v810_v49 = vadd.f32 %v2022_v47, %v2668_v55  ;;  %v790_v50 = vpop.f32.mrb[5].mxu0  ;;  %v1249_v47 = vmul.bf16 %v2312_v44, %v1177_v46 }
 0x2b4   : > { %v809_v52 = vadd.f32 %v790_v50, %v2660_v51 }
 0x2b5   : > { %v821_v53 = vadd.f32 %v1853_v48, %v810_v49  ;;  %2086 = vmatprep.subr.bf16.mxu0 %v1249_v47 }
 0x2b6   : > { %v820_v54 = vadd.f32 %v1853_v48, %v809_v52  ;;  %v2025_v56 = vpop.f32.mrb[6].mxu0  ;;  %2087 = vmatpush3.bf16.msra.mxu0 %v1249_v47 }
 0x2b7   : > { %v812_v57 = vadd.f32 %v2025_v56, %v2678_v0  ;;  %v800_v58 = vpop.f32.mrb[7].mxu0  ;;  %v825_v59 = vmul.f32 0.2, %v821_v53 }
 0x2b8   : > { %v811_v61 = vadd.f32 %v800_v58, %v2670_v60  ;;  %v824_v62 = vmul.f32 0.2, %v820_v54 }
 0x2b9   : > { %v823_v63 = vadd.f32 %v1853_v48, %v812_v57  ;;  %v829_v1 = vmax.f32 %v821_v53, %v825_v59 }
 0x2ba   : > { %v822_v2 = vadd.f32 %v1853_v48, %v811_v61  ;;  %v2036_v3 = vpop.f32.mrb[8].mxu0  ;;  %v828_v4 = vmax.f32 %v820_v54, %v824_v62 }
 0x2bb   : > { %v2735_v5 = vadd.f32 %v2036_v3, %v829_v1  ;;  %v918_v55 = vpop.f32.mrb[9].mxu0  ;;  %v827_v6 = vmul.f32 0.2, %v823_v63 }
 0x2bc   : > { %v2737_v51 = vadd.f32 %v918_v55, %v828_v4  ;;  %v826_v7 = vmul.f32 0.2, %v822_v2  ;;  %v1410_v55 = vld [vmem:[%s2932_s10] sm:$0xff] }
 0x2bd   : > { %v831_v8 = vmax.f32 %v823_v63, %v827_v6  ;;  %v1411_v6 = vld [vmem:[%s2932_s10 + $0x8] sm:$0xff] }
 0x2be   : > { %941 = vmax.xlane.f32.xlu0 %v2737_v51  ;;  %v2039_v0 = vpop.f32.mrb[10].mxu0  ;;  %v830_v9 = vmax.f32 %v822_v2, %v826_v7  ;;  %v1412_v7 = vld [vmem:[%s2932_s10 + $0x10] sm:$0xff] }
 0x2bf   : > { %v2740_v10 = vadd.f32 %v2039_v0, %v831_v8  ;;  %v928_v60 = vpop.f32.mrb[11].mxu0  ;;  %v1413_v8 = vld [vmem:[%s2932_s10 + $0x18] sm:$0xff] }
 0x2c0   : > { %v2742_v11 = vadd.f32 %v928_v60, %v830_v9  ;;  %v2242_v0 = vpack.c.bf16 %v1413_v8, %v1412_v7 }
 0x2c2   : > { %943 = vmax.xlane.f32.xlu0 %v2735_v5  ;;  %945 = vmax.xlane.f32.xlu1 %v2742_v11 }
 0x2c6   : > { %947 = vmax.xlane.f32.xlu1 %v2740_v10 }
 0x34b   : > { %v942_v48 = vpop.xlane.xlu0 %941 }
 0x34c   : > { %v949_v49 = vsub.f32 %v2737_v51, %v942_v48  ;;  %v2238_v51 = vpack.c.bf16 %v1411_v6, %v1410_v55 }
 0x34e   : > { %v953_v50 = vmul.f32 1.442695, %v949_v49  ;;  %2239 = vmatprep.subr.bf16.mxu0 %v2238_v51 }
 0x34f   : > { %v944_v52 = vpop.xlane.xlu0 %943  ;;  %v946_v53 = vpop.xlane.xlu1 %945 }
 0x350   : > { %2313 = vpow2.f32 %v953_v50  ;;  %v950_v54 = vsub.f32 %v2735_v5, %v944_v52  ;;  %v951_v56 = vsub.f32 %v2742_v11, %v946_v53 }
 0x352   : > { %v955_v57 = vmul.f32 1.442695, %v950_v54  ;;  %v957_v58 = vmul.f32 1.442695, %v951_v56 }
 0x353   : > { %v948_v59 = vpop.xlane.xlu1 %947 }
 0x354   : > { %2315 = vpow2.f32 %v955_v57  ;;  %v952_v61 = vsub.f32 %v2740_v10, %v948_v59 }
 0x355   : > { %2317 = vpow2.f32 %v957_v58 }
 0x356   : > { %v959_v62 = vmul.f32 1.442695, %v952_v61 }
 0x358   : > { %2319 = vpow2.f32 %v959_v62 }
 0x35a   : > { %v2314_v63 = vpop.eup %2313 }
 0x35b   : > { %2124 = vmatprep.mubr.f32.mxu1 %v2314_v63 }
 0x35e   : > { %v2316_v1 = vpop.eup %2315 }
 0x35f   : > { %v2318_v2 = vpop.eup %2317  ;;  %2125 = vmatmul.mubr.f32.vlgmr.msra.gmra.mrb[24].mxu1 %v2316_v1  ;;  %v1250_v3 = vpack.c.bf16 %v2316_v1, %v2314_v63 }
 0x360   : > { %2127 = vmatprep.mubr.f32.mxu1 %v2318_v2  ;;  %2249 = vmatpush3.bf16.msra.mxu1 %v2246_v26 }
 0x361   : > { %2088 = vmatprep.mubr.bf16.mxu0 %v1250_v3  ;;  %2251 = vmatprep.subr.bf16.mxu1 %v2250_v29 }
 0x362   : > { %v2320_v4 = vpop.eup %2319 }
 0x363   : > { %2128 = vmatmul.mubr.f32.gmra.mrb[26].mxu1 %v2320_v4  ;;  %v1251_v5 = vpack.c.bf16 %v2320_v4, %v2318_v2 }
 0x364   : > { %2253 = vmatpush3.bf16.msra.mxu1 %v2250_v29 }
 0x365   : > { %2089 = vmatmul.mubr.bf16.vlgmr.msra.gmra.mrb[12].mxu0 %v1251_v5  ;;  %2255 = vmatprep.subr.bf16.mxu1 %v2254_v32 }
 0x366   : > { %2241 = vmatpush3.bf16.msra.mxu0 %v2238_v51 }
 0x367   : > { %2243 = vmatprep.subr.bf16.mxu0 %v2242_v0 }
 0x368   : > { %2257 = vmatpush3.bf16.msra.mxu1 %v2254_v32 }
 0x369   : > { %2259 = vmatprep.subr.bf16.mxu1 %v2258_v35 }
 0x36a   : > { %2245 = vmatpush3.bf16.msra.mxu0 %v2242_v0 }
 0x36c   : > { %2261 = vmatpush3.bf16.msra.mxu1 %v2258_v35 }
 0x432   : > { %v2126_v9 = vpop.f32.mrb[24].mxu1 }
 0x433   : > { %2321 = vrcp.f32 %v2126_v9  ;;  %v1383_v10 = vpop.f32.mrb[25].mxu1 }
 0x434   : > { %2323 = vrcp.f32 %v1383_v10 }
 0x436   : > { %v2129_v60 = vpop.f32.mrb[26].mxu1 }
 0x437   : > { %2325 = vrcp.f32 %v2129_v60  ;;  %v1393_v11 = vpop.f32.mrb[27].mxu1 }
 0x438   : > { %2327 = vrcp.f32 %v1393_v11  ;;  %v2090_v12 = vpop.f32.mrb[12].mxu0 }
 0x439   : > { %v1286_v13 = vpop.f32.mrb[13].mxu0 }
 0x43a   : > { %v2091_v14 = vpop.f32.mrb[14].mxu0 }
 0x43b   : > { %v1289_v15 = vpop.f32.mrb[15].mxu0 }
 0x43d   : > { %v2322_v16 = vpop.eup %2321 }
 0x43e   : > { %v2324_v17 = vpop.eup %2323  ;;  %v1407_v18 = vmul.f32 %v2322_v16, %v1289_v15 }
 0x43f   : > { %v1406_v19 = vmul.f32 %v2324_v17, %v1286_v13 }
 0x441   : > { %v2326_v20 = vpop.eup %2325  ;;  %2138 = vmatprep.mubr.msk.f32.mxu0 %vm506_vm0, %v1406_v19 }
 0x442   : > { %v2328_v21 = vpop.eup %2327  ;;  %v1409_v22 = vmul.f32 %v2326_v20, %v2091_v14  ;;  %2139 = vmatmul.mubr.msk.f32.vlgmr.msra.gmra.mrb[16].mxu0 %vm506_vm0, %v1407_v18 }
 0x443   : > { %v1408_v23 = vmul.f32 %v2328_v21, %v2090_v12 }
 0x445   : > { %2141 = vmatprep.mubr.msk.f32.mxu0 %vm506_vm0, %v1408_v23 }
 0x446   : > { %2142 = vmatmul.mubr.msk.f32.gmra.mrb[18].mxu0 %vm506_vm0, %v1409_v22 }
 0x515   : > { %v2140_v37 = vpop.f32.mrb[16].mxu0 }
 0x516   : > { %v2833_v38 = vadd.f32 %v2140_v37, %v1886_v36  ;;  %v1499_v39 = vpop.f32.mrb[17].mxu0 }
 0x517   : > { %v2835_v40 = vadd.f32 %v1886_v36, %v1499_v39 }
 0x518   : > { %v2838_v41 = vmul.f32 0.70710677, %v2833_v38 }
 0x519   : > { %v2841_v42 = vmul.f32 0.70710677, %v2835_v40  ;;  %v2143_v43 = vpop.f32.mrb[18].mxu0 }
 0x51a   : > { %v1527_v44 = vand.u32 2147483647, %v2838_v41  ;;  %v2844_v45 = vadd.f32 %v2143_v43, %v1886_v36  ;;  %v1509_v46 = vpop.f32.mrb[19].mxu0  ;;  %vm1607_vm1 = vcmp.ge.f32.partialorder %v2838_v41, 0.0 }
 0x51b   : > { %v1526_v47 = vand.u32 2147483647, %v2841_v42  ;;  %v2847_v48 = vadd.f32 %v1886_v36, %v1509_v46  ;;  %vm1606_vm2 = vcmp.ge.f32.partialorder %v2841_v42, 0.0 }
 0x51c   : > { %v1531_v49 = vmul.f32 0.3275911, %v1527_v44  ;;  %v2850_v50 = vmul.f32 0.70710677, %v2844_v45  ;;  %v1583_v1 = vsub.f32 0.0, %v1527_v44 }
 0x51d   : > { %v1530_v52 = vmul.f32 0.3275911, %v1526_v47  ;;  %v2853_v53 = vmul.f32 0.70710677, %v2847_v48  ;;  %v1582_v2 = vsub.f32 0.0, %v1526_v47 }
 0x51e   : > { %v1535_v54 = vadd.f32 1.0, %v1531_v49  ;;  %v1529_v56 = vand.u32 2147483647, %v2850_v50  ;;  %v1587_v4 = vmul.f32 %v1583_v1, %v1527_v44  ;;  %vm1609_vm3 = vcmp.ge.f32.partialorder %v2850_v50, 0.0 }
 0x51f   : > { %v1534_v57 = vadd.f32 1.0, %v1530_v52  ;;  %v1528_v58 = vand.u32 2147483647, %v2853_v53  ;;  %v1586_v51 = vmul.f32 %v1582_v2, %v1526_v47  ;;  %vm1608_vm5 = vcmp.ge.f32.partialorder %v2853_v53, 0.0  ;;  %v1891_v53 = vld [vmem:[%s2935_s13] ss:$0 sm:$0xff] }
 0x520   : > { %2329 = vrcp.f32 %v1535_v54  ;;  %v1533_v59 = vmul.f32 0.3275911, %v1529_v56  ;;  %v1585_v5 = vsub.f32 0.0, %v1529_v56  ;;  %v1592_v10 = vmul.f32 1.442695, %v1587_v4 }
 0x521   : > { %2331 = vrcp.f32 %v1534_v57  ;;  %v1532_v61 = vmul.f32 0.3275911, %v1528_v58  ;;  %v1584_v7 = vsub.f32 0.0, %v1528_v58  ;;  %v1590_v14 = vmul.f32 1.442695, %v1586_v51 }
 0x522   : > { %v1537_v62 = vadd.f32 1.0, %v1533_v59  ;;  %v1589_v11 = vmul.f32 %v1585_v5, %v1529_v56 }
 0x523   : > { %v1536_v63 = vadd.f32 1.0, %v1532_v61  ;;  %v1588_v16 = vmul.f32 %v1584_v7, %v1528_v58 }
 0x524   : > { %2333 = vrcp.f32 %v1537_v62  ;;  %v1596_v22 = vmul.f32 1.442695, %v1589_v11  ;;  %v1518_v11 = vmul.f32 0.5, %v2835_v40  ;;  %v1521_v40 = vmul.f32 0.5, %v2844_v45 }
 0x525   : > { %2335 = vrcp.f32 %v1536_v63  ;;  %v1594_v26 = vmul.f32 1.442695, %v1588_v16 }
 0x526   : > { %2337 = vpow2.f32 %v1592_v10 }
 0x527   : > { %2339 = vpow2.f32 %v1590_v14 }
 0x528   : > { %2341 = vpow2.f32 %v1596_v22 }
 0x529   : > { %2343 = vpow2.f32 %v1594_v26 }
 0x52a   : > { %v2330_v3 = vpop.eup %2329 }
 0x52b   : > { %v2332_v55 = vpop.eup %2331  ;;  %v1547_v6 = vmul.f32 1.0614054, %v2330_v3 }
 0x52c   : > { %v1546_v8 = vmul.f32 1.0614054, %v2332_v55 }
 0x52d   : > { %v1551_v0 = vadd.f32 -1.4531521, %v1547_v6 }
 0x52e   : > { %v2334_v9 = vpop.eup %2333  ;;  %v1550_v60 = vadd.f32 -1.4531521, %v1546_v8 }
 0x52f   : > { %v2336_v12 = vpop.eup %2335  ;;  %v1555_v13 = vmul.f32 %v2330_v3, %v1551_v0  ;;  %v1549_v15 = vmul.f32 1.0614054, %v2334_v9 }
 0x530   : > { %v1554_v17 = vmul.f32 %v2332_v55, %v1550_v60  ;;  %v1548_v18 = vmul.f32 1.0614054, %v2336_v12  ;;  %v2338_v49 = vpop.eup %2337 }
 0x531   : > { %v1559_v19 = vadd.f32 1.4214138, %v1555_v13  ;;  %v1553_v20 = vadd.f32 -1.4531521, %v1549_v15  ;;  %v2340_v56 = vpop.eup %2339 }
 0x532   : > { %v1558_v21 = vadd.f32 1.4214138, %v1554_v17  ;;  %v1552_v23 = vadd.f32 -1.4531521, %v1548_v18  ;;  %v2342_v1 = vpop.eup %2341  ;;  %v1520_v18 = vmul.f32 0.5, %v2847_v48 }
 0x533   : > { %v1563_v24 = vmul.f32 %v2330_v3, %v1559_v19  ;;  %v1557_v25 = vmul.f32 %v2334_v9, %v1553_v20  ;;  %v2344_v5 = vpop.eup %2343 }
 0x534   : > { %v1562_v27 = vmul.f32 %v2332_v55, %v1558_v21  ;;  %v1556_v28 = vmul.f32 %v2336_v12, %v1552_v23 }
 0x535   : > { %v1567_v29 = vadd.f32 -0.28449672, %v1563_v24  ;;  %v1561_v30 = vadd.f32 1.4214138, %v1557_v25 }
 0x536   : > { %v1566_v31 = vadd.f32 -0.28449672, %v1562_v27  ;;  %v1560_v32 = vadd.f32 1.4214138, %v1556_v28 }
 0x537   : > { %v1571_v33 = vmul.f32 %v2330_v3, %v1567_v29  ;;  %v1565_v34 = vmul.f32 %v2334_v9, %v1561_v30 }
 0x538   : > { %v1570_v35 = vmul.f32 %v2332_v55, %v1566_v31  ;;  %v1564_v36 = vmul.f32 %v2336_v12, %v1560_v32 }
 0x539   : > { %v1575_v37 = vadd.f32 0.2548296, %v1571_v33  ;;  %v1569_v39 = vadd.f32 -0.28449672, %v1565_v34 }
 0x53a   : > { %v1574_v43 = vadd.f32 0.2548296, %v1570_v35  ;;  %v1568_v44 = vadd.f32 -0.28449672, %v1564_v36 }
 0x53b   : > { %v1579_v46 = vmul.f32 %v2330_v3, %v1575_v37  ;;  %v1573_v47 = vmul.f32 %v2334_v9, %v1569_v39 }
 0x53c   : > { %v1578_v52 = vmul.f32 %v2332_v55, %v1574_v43  ;;  %v1572_v54 = vmul.f32 %v2336_v12, %v1568_v44 }
 0x53d   : > { %v1599_v57 = vmul.f32 %v2338_v49, %v1579_v46  ;;  %v1577_v58 = vadd.f32 0.2548296, %v1573_v47 }
 0x53e   : > { %v1598_v59 = vmul.f32 %v2340_v56, %v1578_v52  ;;  %v1576_v61 = vadd.f32 0.2548296, %v1572_v54 }
 0x53f   : > { %v1603_v62 = vsub.f32 1.0, %v1599_v57  ;;  %v1581_v63 = vmul.f32 %v2334_v9, %v1577_v58 }
 0x540   : > { %v1602_v2 = vsub.f32 1.0, %v1598_v59  ;;  %v1580_v4 = vmul.f32 %v2336_v12, %v1576_v61  ;;  %v1519_v12 = vmul.f32 0.5, %v2833_v38 }
 0x541   : > { %v1611_v6 = vsub.f32 0.0, %v1603_v62  ;;  %v1601_v51 = vmul.f32 %v2342_v1, %v1581_v63 }
 0x542   : > { %v1610_v3 = vsub.f32 0.0, %v1602_v2  ;;  %v1600_v7 = vmul.f32 %v2344_v5, %v1580_v4 }
 0x543   : > { %v1615_v8 = vsel %vm1607_vm1, %v1603_v62, %v1611_v6  ;;  %v1605_v55 = vsub.f32 1.0, %v1601_v51 }
 0x544   : > { %v1619_v0 = vadd.f32 1.0, %v1615_v8  ;;  %v1614_v10 = vsel %vm1606_vm2, %v1602_v2, %v1610_v3  ;;  %v1604_v60 = vsub.f32 1.0, %v1600_v7 }
 0x545   : > { %v1618_v9 = vadd.f32 1.0, %v1614_v10  ;;  %v1613_v13 = vsub.f32 0.0, %v1605_v55 }
 0x546   : > { %v1612_v14 = vsub.f32 0.0, %v1604_v60  ;;  %v1623_v42 = vmul.f32 %v1619_v0, %v1519_v12 }
 0x547   : > { %v1622_v41 = vmul.f32 %v1618_v9, %v1518_v11  ;;  %v1617_v15 = vsel %vm1609_vm3, %v1605_v55, %v1613_v13 }
 0x548   : > { %v1621_v16 = vadd.f32 1.0, %v1617_v15  ;;  %v1616_v17 = vsel %vm1608_vm5, %v1604_v60, %v1612_v14 }
 0x549   : > { %v1620_v19 = vadd.f32 1.0, %v1616_v17  ;;  %2160 = vmatprep.mubr.msk.f32.mxu1 %vm1641_vm4, %v1622_v41 }
 0x54a   : > { %2161 = vmatmul.mubr.msk.f32.vlgmr.msra.gmra.mrb[28].mxu1 %vm1641_vm4, %v1623_v42  ;;  %v1625_v50 = vmul.f32 %v1621_v16, %v1521_v40 }
 0x54b   : > { %v1624_v38 = vmul.f32 %v1620_v19, %v1520_v18 }
 0x54d   : > { %2163 = vmatprep.mubr.msk.f32.mxu1 %vm1641_vm4, %v1624_v38 }
 0x54e   : > { %2164 = vmatmul.mubr.msk.f32.gmra.mrb[30].mxu1 %vm1641_vm4, %v1625_v50 }
 0x61d   : > { %v2162_v20 = vpop.f32.mrb[28].mxu1 }
 0x61e   : > { %v1726_v21 = vadd.f32 %v2162_v20, %v1891_v53  ;;  %v1720_v22 = vpop.f32.mrb[29].mxu1 }
 0x61f   : > { %v1721_v48 = vadd.f32 %v1891_v53, %v1720_v22 }
 0x620   : > { %1740 = vst.msk [vmem:[%s475_s27 + $0x8] sm:$0xff] %vm506_vm0, %v1726_v21 }
 0x621   : > { %1739 = vst.msk [vmem:[%s475_s27] sm:$0xff] %vm506_vm0, %v1721_v48  ;;  %v2165_v45 = vpop.f32.mrb[30].mxu1 }
 0x622   : > { %v1736_v23 = vadd.f32 %v2165_v45, %v1891_v53  ;;  %v1730_v24 = vpop.f32.mrb[31].mxu1 }
 0x623   : > { %v1731_v25 = vadd.f32 %v1891_v53, %v1730_v24 }
 0x624   : > { %1742 = vst.msk [vmem:[%s475_s27 + $0x18] sm:$0xff] %vm506_vm0, %v1736_v23 }
 0x625   : > { %1741 = vst.msk [vmem:[%s475_s27 + $0x10] sm:$0xff] %vm506_vm0, %v1731_v25 }
 0x626   : > { %2358 = shalt.err (!%p2355_p3)
}
 0x627   : > { %s2359_s20 = scalar_lea.hbm %s2877_s22, 512  ;;  %s2363_s28 = scalar_lea.hbm %s2936_s14, 1024 }
 0x628   : > { %p2360_p4 = scmp.ne.s32.totalorder %s2877_s22, %s2359_s20  ;;  %p2364_p9 = scmp.lt.u32.totalorder %s2877_s22, %s2936_s14 }
 0x629   : > { %p2365_p10 = scmp.lt.u32.totalorder %s2363_s28, %s2359_s20  ;;  %p2367_p12 = scmp.lt.u32.totalorder %s2359_s20, %s2877_s22 }
 0x62a   : > { %p2361_p7 = pnand %p2360_p4, %p2527_p5 }
 0x62b   : > { %p2366_p11 = por %p2365_p10, %p2364_p9 }
 0x62c   : > { %p2362_p8 = pneg %p2361_p7 }
 0x62d   : > { %p2368_p13 = por %p2367_p12, %p2366_p11 }
 0x62f   : > { %p2369_p0 = pnand %p2368_p13, %p2362_p8 }
 0x631   : > { %2372 = shalt.err (!%p2369_p0)
}
 0x632   : > { %s2412_s0 = smov 128   ;;  %s2413_s19 = smov 8  }
 0x633   : > { %2262 = dma.vmem_to_hbm [thread:$0]  (%p2527_p5), %s2872_s26, 512, %s2877_s22, %s2881_s17, %s2412_s0, %s2412_s0, %s2413_s19  }
 0x634 PF: > { %p2268_p1 = scmp.ge.s32.totalorder %s2407_s16, 2  ;;  %s1772_s25 = sand.u32 1, %s2395_s29  }
 0x635   : > { %s1773_s20 = scalar_lea.sflag [#allocation3], %s1772_s25 }
 0x636   : > { %p2265_p2 = pnand %p2268_p1, %p2531_p6 }
 0x638   : > { %2390 = dma.done.wait (!%p2265_p2), %s1773_s20, 512  }
 0x639   : > { %2392 = vsyncadd (!%p2265_p2), %s1773_s20, 4294966784  ;;  %s2949_s16 = sld [smem:[#allocation6_spill]]  ;;  %s2950_s27 = sld [smem:[#allocation5_spill]] }
 0x63a   : > { %s2951_s15 = sld [smem:[#allocation7_spill]]  ;;  %s2952_s29 = smov %s2399_s30 }
 0x63f   : > { %p24_p3 = scmp.ge.s32.totalorder %s2949_s16, 4   ;;  %s2953_s30 = smov %s2950_s27 }
 0x641   :  { %26 = sbr.rel (!%p24_p3) target bundleno = 5 (0x5), region = 114 }
 0x648   :  { %1778 = vsyncpa [#allocation3], 1 }
 0x649   :  { %1780 = vsyncpa [#allocation3 + $0x1], 1 }

</bundles_post_ra>
